<compile_context>
chip_gen: v5e
topology: v5e:2x2
jax: 0.10.0
libtpu: 0.0.40
codegen_flags: <defaults>
</compile_context>

<pallas_src>
import jax
import jax.numpy as jnp
from jax import lax
from jax.experimental import pallas as pl
from jax.experimental.pallas import tpu as pltpu


def _pick_hw_block(hw: int, target: int = 2048) -> int:
    """Lane-dense spatial tile: full extent if small, else a multiple-of-128
    tile (preferring an exact divisor of H*W so no trailing partial block)."""
    if hw <= target:
        return hw
    for cand in range(target, 127, -128):
        if hw % cand == 0:
            return cand
    return target  # trailing partial block; Pallas masks the writeback


def _make_kernel(c_in: int, w: int, hw_blk: int, scale: float, with_r: bool):
    """Kernel over lane-dense (1, C, HW_BLK) -> (1, C_out, HW_BLK) tiles."""

    def kernel(x_ref, o_ref):
        # Pure streaming copy of the input channels (unmasked, lane-dense).
        o_ref[:, :c_in, :] = x_ref[...]

        # y-coordinate channel: value for flattened position p is (p // W),
        # normalized to [-1, 1] via a single multiply-add.  Tiny VPU work,
        # fully hidden under the DMA bound.
        base = pl.program_id(1) * hw_blk
        lane = lax.broadcasted_iota(jnp.int32, (1, 1, hw_blk), 2)
        yy = lax.div(lane + base, jnp.int32(w)).astype(jnp.float32)
        coord = yy * jnp.float32(scale) - 1.0
        o_ref[:, c_in:c_in + 1, :] = coord.astype(o_ref.dtype)

        if with_r:
            # rr = sqrt((coord - 0.5)^2) == |coord - 0.5|
            rr = jnp.abs(coord - 0.5)
            o_ref[:, c_in + 1:c_in + 2, :] = rr.astype(o_ref.dtype)

    return kernel


def add_coords(x: jax.Array, with_r: bool = False) -> jax.Array:
    """Pallas implementation of AddCoords.forward for NCHW input."""
    N, C, H, W = x.shape
    extra = 2 if with_r else 1
    c_out = C + extra
    HW = H * W

    hw_blk = _pick_hw_block(HW)
    n_hw = pl.cdiv(HW, hw_blk)

    denom = float(H - 1)
    # H == 1 -> inf scale (0 * inf -> nan), matching the torch float division.
    scale = (2.0 / denom) if denom != 0.0 else float("inf")

    x_flat = x.reshape(N, C, HW)  # free row-major view, lane-dense last dim
    kernel = _make_kernel(C, W, hw_blk, scale, with_r)

    out_flat = pl.pallas_call(
        kernel,
        out_shape=jax.ShapeDtypeStruct((N, c_out, HW), x.dtype),
        grid_spec=pltpu.PrefetchScalarGridSpec(
            num_scalar_prefetch=0,
            grid=(N, n_hw),
            in_specs=[
                # If DMA is still exposed after tiling, pipeline_mode=pl.Buffered(3)
                # can be added here; tiles are already sized for the HBM roofline.
                pl.BlockSpec((1, C, hw_blk), lambda n, s: (n, 0, s)),
            ],
            out_specs=pl.BlockSpec((1, c_out, hw_blk), lambda n, s: (n, 0, s)),
        ),
        compiler_params=pltpu.CompilerParams(
            dimension_semantics=("parallel", "parallel"),
            vmem_limit_bytes=32 * 1024 * 1024,
        ),
    )(x_flat)

    return out_flat.reshape(N, c_out, H, W)


def add_coords_ref(x: jax.Array, with_r: bool = False) -> jax.Array:
    """Pure-JAX reference mirroring the PyTorch forward (dtype-preserving)."""
    N, C, H, W = x.shape
    yy = jnp.arange(H, dtype=jnp.float32)[None, None, :, None]
    coord = jnp.broadcast_to(yy, (N, 1, H, W)) / (H - 1) * 2.0 - 1.0
    out = jnp.concatenate([x, coord.astype(x.dtype)], axis=1)
    if with_r:
        rr = jnp.sqrt(jnp.square(coord - 0.5)).astype(x.dtype)
        out = jnp.concatenate([out, rr], axis=1)
    return out


if __name__ == "__main__":
    key = jax.random.PRNGKey(0)

    # Small shape implied by the module spec.
    N, C, H, W = 2, 4, 16, 16
    x = jax.random.normal(key, (N, C, H, W), dtype=jnp.float32)

    # with_r = False (module default)
    out = jax.block_until_ready(add_coords(x, with_r=False))
    ref = add_coords_ref(x, with_r=False)
    assert out.shape == (N, C + 1, H, W)
    assert jnp.allclose(out, ref, atol=1e-6), "mismatch vs reference (with_r=False)"

    # with_r = True
    out_r = jax.block_until_ready(add_coords(x, with_r=True))
    ref_r = add_coords_ref(x, with_r=True)
    assert out_r.shape == (N, C + 2, H, W)
    assert jnp.allclose(out_r, ref_r, atol=1e-6), "mismatch vs reference (with_r=True)"

    # Larger shape to exercise the spatial-tiling path (H*W = 4096 -> 2 lane tiles).
    x2 = jax.random.normal(jax.random.PRNGKey(0), (2, 8, 64, 64), dtype=jnp.float32)
    out2 = jax.block_until_ready(add_coords(x2, with_r=True))
    ref2 = add_coords_ref(x2, with_r=True)
    assert out2.shape == (2, 10, 64, 64)
    assert jnp.allclose(out2, ref2, atol=1e-6), "mismatch vs reference (tiled path)"

    print("KERNEL_OK")
</pallas_src>

<mosaic_0001>
module attributes {stable_mosaic.version = 11 : i64} {
  func.func @kernel(%arg0: i32, %arg1: i32, %arg2: memref<1x4x256xf32, #tpu.memory_space<vmem>>, %arg3: memref<1x5x256xf32, #tpu.memory_space<vmem>>) attributes {dimension_semantics = [#tpu.dimension_semantics<parallel>, #tpu.dimension_semantics<parallel>], iteration_bounds = array<i64: 2, 1>, scalar_prefetch = 0 : i64, scratch_operands = 0 : i64, tpu.core_type = #tpu.core_type<tc>, window_params = [{transform_indices = @transform_0, window_bounds = array<i64: 1, 4, 256>}, {transform_indices = @transform_1, window_bounds = array<i64: 1, 5, 256>}]} {
    %c0 = arith.constant 0 : index
    %c0_0 = arith.constant 0 : index
    %c0_1 = arith.constant 0 : index
    %0 = vector.load %arg2[%c0, %c0_0, %c0_1] : memref<1x4x256xf32, #tpu.memory_space<vmem>>, vector<1x4x256xf32>
    %c0_2 = arith.constant 0 : index
    %c0_3 = arith.constant 0 : index
    %c0_4 = arith.constant 0 : index
    %1 = vector.load %arg3[%c0_2, %c0_3, %c0_4] : memref<1x5x256xf32, #tpu.memory_space<vmem>>, vector<1x4x256xf32>
    tpu.vector_store %arg3[%c0_2, %c0_3, %c0_4], %0 {strides = array<i32>} : memref<1x5x256xf32, #tpu.memory_space<vmem>>, vector<1x4x256xf32>,
    %c256_i32 = arith.constant 256 : i32
    %2 = arith.muli %arg1, %c256_i32 : i32
    %3 = tpu.iota {dimensions = array<i32: 2>} : vector<1x1x256xi32>
    %4 = vector.broadcast %2 : i32 to vector<1x1x256xi32>
    %5 = arith.addi %3, %4 : vector<1x1x256xi32>
    %c16_i32 = arith.constant 16 : i32
    %6 = vector.broadcast %c16_i32 : i32 to vector<1x1x256xi32>
    %7 = arith.divsi %5, %6 : vector<1x1x256xi32>
    %8 = arith.sitofp %7 : vector<1x1x256xi32> to vector<1x1x256xf32>
    %cst = arith.constant 0.13333334 : f32
    %9 = vector.broadcast %cst : f32 to vector<1x1x256xf32>
    %10 = arith.mulf %8, %9 : vector<1x1x256xf32>
    %cst_5 = arith.constant 1.000000e+00 : f32
    %11 = vector.broadcast %cst_5 : f32 to vector<1x1x256xf32>
    %12 = arith.subf %10, %11 : vector<1x1x256xf32>
    %c0_6 = arith.constant 0 : index
    %c4 = arith.constant 4 : index
    %c0_7 = arith.constant 0 : index
    %13 = vector.load %arg3[%c0_6, %c4, %c0_7] : memref<1x5x256xf32, #tpu.memory_space<vmem>>, vector<1x1x256xf32>
    tpu.vector_store %arg3[%c0_6, %c4, %c0_7], %12 {strides = array<i32>} : memref<1x5x256xf32, #tpu.memory_space<vmem>>, vector<1x1x256xf32>,
    return
  }
  func.func @transform_0(%arg0: i32, %arg1: i32) -> (i32, i32, i32) {
    %c0_i32 = arith.constant 0 : i32
    %c0_i32_0 = arith.constant 0 : i32
    return %arg0, %c0_i32, %arg1 : i32, i32, i32
  }
  func.func @transform_1(%arg0: i32, %arg1: i32) -> (i32, i32, i32) {
    %c0_i32 = arith.constant 0 : i32
    %c0_i32_0 = arith.constant 0 : i32
    return %arg0, %c0_i32, %arg1 : i32, i32, i32
  }
}

</mosaic_0001>

<bundles_post_ra>
// kernel: tpu_custom_call.1
= control target key start
LH: loop header
LB: loop body
LE: loop exit
PB: predicated region body
PF: predicated region fallthrough
CT: control target
= control target key end

     0   :  { %6 = vsyncpa [#allocation3], 0  ;;  %s562_s0 = inlined_call_operand.hbm [shape: f32[2,4,256], index: 0, kind: input, shape index: {}]   ;;  %s563_s1 = inlined_call_operand.vmem [shape: f32[2,5,256], index: 1, kind: output, shape index: {}]  }
   0x1   :  { %8 = vsyncpa [#allocation3 + $0x1], 0  ;;  %s474_s6 = smov 0   ;;  %s476_s7 = smov 0  }
   0x2   :  { %s478_s8 = smov 0   ;;  %s480_s9 = smov 0  }
   0x3   :  { %s482_s10 = smov 0   ;;  %s484_s11 = smov 0  }
   0x4 LB: > { %s309_s12 = sadd.s32 4294967295, %s462_s11   ;;  %s26_s13 = sadd.s32 1, %s458_s10  ;;  %s462_s11 = sphi %s484_s11, %s14_s11   ;;  %s458_s10 = sphi %s482_s10, %s570_s10   ;;  %s454_s9 = sphi %s480_s9, %s569_s9   ;;  %s450_s8 = sphi %s478_s8, %s568_s8   ;;  %s446_s7 = sphi %s476_s7, %s567_s7   ;;  %s442_s6 = sphi %s474_s6, %s566_s6  }
   0x5   : > { %p28_p0 = scmp.ge.s32.totalorder %s26_s13, 2  ;;  %s35_s14 = sadd.s32 1, %s450_s8 }
   0x6   : > { %p42_p1 = scmp.ne.s32.totalorder %s450_s8, %s446_s7  ;;  %p43_p2 = scmp.eq.s32.totalorder %s462_s11, 0 }
   0x7   : > { %s572_s13 = smov (%p28_p0, %s26_s13), 0  ;;  %p48_p4 = scmp.ne.s32.totalorder %s446_s7, %s442_s6 }
   0x8   : > { %p510_p3 = por %p43_p2, %p42_p1  ;;  %s30_s16 = ssub.s32 %s458_s10, %s572_s13 }
   0x9   : > { %p49_p5 = scmp.eq.s32.totalorder %s309_s12, 0  ;;  %p33_p6 = scmp.eq.s32.totalorder %s30_s16, 0 }
   0xa   : > { %p333_p8 = scmp.lt.s32.totalorder %s462_s11, 2  ;;  %s100_s19 = sand.u32 1, %s450_s8  }
   0xb   : > { %p517_p7 = por %p49_p5, %p48_p4  ;;  %s325_s20 = sshll.u32 %s458_s10, 3 }
   0xc   : > { %s523_s18 = scalar_select %p33_p6, %s450_s8, %s35_s14  }
   0xd   : > { %s313_s21 = sshll.u32 %s100_s19, 3  ;;  %s111_s24 = scalar_lea.hbm %s562_s0, %s325_s20 }
   0xe   : > { %s113_s25 = sshll.u32 %s111_s24, 4  ;;  %s104_s26 = scalar_lea.vmem [#allocation2], %s313_s21  ;;  %s114_s25 = int_to_ptr.hbm [resolvable:$true] %s113_s25 }
   0xf   : > { %s115_s27 = sshll.u32 %s104_s26, 4  ;;  %p330_p9 = pnand %p333_p8, %p510_p3  ;;  %s116_s27 = int_to_ptr.vmem [resolvable:$true] %s115_s27 }
  0x10   : > { %p316_p10 = scmp.ge.s32.totalorder %s462_s11, 1  ;;  %p120_p11 = scmp.lt.s32.totalorder %s462_s11, 3 }
  0x11   : > { %s101_s28 = scalar_lea.sflag [#allocation3], %s100_s19 }
  0x12   : > { %332 = dma.hbm_to_vmem [thread:$0]  (!%p330_p9), %s114_s25, 128, %s116_s27, %s101_s28  }
  0x13   : > { %p121_p12 = pnand %p316_p10, %p120_p11 }
  0x14   : > { %s126_s29 = sand.u32 (!%p121_p12), 1, %s446_s7  }
  0x15   : > { %124 = sbr.rel (%p121_p12) target bundleno = 45 (0x2d), region = 24  ;;  %s317_s30 = sshll.u32 (!%p121_p12), %s126_s29, 3 }
  0x16   : > { %s127_s2 = scalar_lea.sflag (!%p121_p12), [#allocation3], %s126_s29  ;;  %s130_s3 = scalar_lea.vmem (!%p121_p12), [#allocation2], %s317_s30 }
  0x1a   : > { %437 = dma.done.wait (%p517_p7), %s127_s2, 128  }
  0x1b   : > { %439 = vsyncadd (%p517_p7), %s127_s2, 4294967168  ;;  %v175_v0 = vlaneseq  ;;  %p156_p13 = scmp.lt.s32.totalorder %s454_s9, 1  ;;  %v165_v6 = vld [vmem:[%s130_s3] sm:$0xff]  ;;  %vm204_vm0 = vcmask 1040384  }
  0x1c   : > { %167 = vst [vmem:[#allocation1] ss:$2 sm:$0xff] %v165_v6 }
  0x1d   : > { %v176_v1 = vand.u32 127, %v175_v0  ;;  %s574_s9 = smov (!%p156_p13, %s454_s9), 1  ;;  %vm209_vm1 = vcmp.lt.s32.totalorder %v175_v0, 256 }
  0x1e   : > { %s326_s4 = sshll.u32 %s574_s9, 4 }
  0x1f   : > { %v177_v2 = vadd.s32 128, %v176_v1  ;;  %v184_v3 = vshrl.u32 %v176_v1, 4  ;;  %s163_s12 = scalar_lea.vmem %s563_s1, %s326_s4 }
  0x21   : > { %v191_v4 = vshrl.u32 %v177_v2, 4  ;;  %v195_v5 = vcvt.s32.f32 %v184_v3 }
  0x23   : > { %v196_v7 = vcvt.s32.f32 %v191_v4  ;;  %v197_v8 = vmul.f32 0.13333334, %v195_v5  ;;  %v168_v13 = vld.sshfl [vmem:[#allocation1] sm:$0xff pattern:$0x75316420] }
  0x24   : > { %v169_v14 = vld.sshfl [vmem:[#allocation1 + $0x8] sm:$0xff pattern:$0x75316420]  ;;  %172 = vst [vmem:[%s163_s12] sm:$0xf] %v168_v13 }
  0x25   : > { %v198_v9 = vmul.f32 0.13333334, %v196_v7  ;;  %v320_v10 = vadd.f32 -1.0, %v197_v8  ;;  %173 = vst [vmem:[%s163_s12 + $0x8] sm:$0xf] %v169_v14 }
  0x27   : > { %v321_v11 = vadd.f32 -1.0, %v198_v9 }
  0x29   : > { %v203_v12 = vrot.slane %v321_v11, 7 }
  0x2b   : > { %v205_v15 = vsel %vm204_vm0, %v320_v10, %v203_v12 }
  0x2c   : > { %322 = vst.msk [vmem:[%s163_s12 + $0x4] ss:$8 sm:$0x3] %vm209_vm1, %v205_v15 }
  0x2d PF: > { %s14_s11 = sadd.s32 1, %s462_s11   ;;  %s566_s6 = smov %s446_s7 }
  0x2e   : > { %p11_p0 = scmp.ge.s32.totalorder %s14_s11, 4   ;;  %s567_s7 = smov %s450_s8 }
  0x2f   : > { %s568_s8 = smov %s523_s18  ;;  %s569_s9 = smov %s458_s10 }
  0x30   : > { %s570_s10 = smov %s572_s13  ;;  %13 = sbr.rel (!%p11_p0) target bundleno = 4 (0x4), region = 65 }
  0x35   :  { %244 = vsyncpa [#allocation3], 1 }
  0x36   :  { %246 = vsyncpa [#allocation3 + $0x1], 1 }

</bundles_post_ra>
